<compile_context>
chip_gen: v5e
topology: v5e:2x2
jax: 0.10.0
libtpu: 0.0.40
codegen_flags: <defaults>
</compile_context>

<pallas_src>
import jax
import jax.numpy as jnp
from jax.experimental import pallas as pl
from jax.experimental.pallas import tpu as pltpu


def _attention_kernel(v_ref, q_ref, w1v_ref, w1q_ref, b1_ref, w2_ref, out_ref):
    # v_ref:   (TB*K, vdim) bf16  row-fused object features for TB batch elements
    # q_ref:   (TB, qdim)   bf16  question features (one row per batch element)
    # w1v_ref: (vdim, H)    bf16  weight-normed FCNet weight, v half (transposed)
    # w1q_ref: (qdim, H)    bf16  weight-normed FCNet weight, q half (transposed)
    # b1_ref:  (1, H)       f32
    # w2_ref:  (1, H)       f32   weight-normed final Linear(num_hid, 1) weight
    # out_ref: (TB, K)      f32   softmax attention weights (K on the lane axis)
    tb, k = out_ref.shape
    h_dim = b1_ref.shape[1]

    # Big MXU matmul over the fused (batch*object) rows, f32 accumulation.
    hv = jnp.dot(v_ref[...], w1v_ref[...], preferred_element_type=jnp.float32)  # (TB*K, H)
    # q projected once per batch element (not once per object).
    hq = jnp.dot(q_ref[...], w1q_ref[...], preferred_element_type=jnp.float32)  # (TB, H)

    # h = relu(v @ W1_v + q @ W1_q + b1), broadcasting the q term over the K objects.
    h = hv.reshape(tb, k, h_dim) + hq[:, None, :] + b1_ref[...]
    h = jnp.maximum(h, 0.0)

    # Final Linear(num_hid, 1) as a VPU multiply + lane reduction (avoids an N=1 MXU matmul).
    # (The scalar bias b2 shifts every logit equally and cancels in the softmax below.)
    logits = jnp.sum(h * w2_ref[...], axis=-1)                                   # (TB, K)

    # Softmax over the K objects (PyTorch dim=1), per batch element.
    m = jnp.max(logits, axis=-1, keepdims=True)
    e = jnp.exp(logits - m)
    denom = jnp.sum(e, axis=-1, keepdims=True)
    out_ref[...] = (e * pl.reciprocal(denom, approx=True)).astype(out_ref.dtype)


def _choose_batch_tile(batch, k, target_rows=512):
    """Largest TB dividing `batch` whose fused row tile TB*K stays near the MXU-friendly
    target, subject to the sublane constraint (TB % 8 == 0 unless TB == batch)."""
    best = batch
    for tb in range(1, batch + 1):
        if batch % tb != 0:
            continue
        if tb != batch and tb % 8 != 0:
            continue
        if tb * k <= target_rows:
            best = tb
    return best


def _vmem_limit_bytes(tm, tb, vdim, qdim, k, h_dim):
    """Rough scoped-VMEM budget: resident weights + double-buffered activation tiles +
    intermediates, with headroom; clamped so it fits every TPU generation."""
    bf16, f32 = 2, 4
    weights = (vdim + qdim) * h_dim * bf16 + 2 * h_dim * f32
    acts_in = (tm * vdim + tb * qdim) * bf16
    acts_out = tb * k * f32
    scratch = (2 * tm * h_dim + tb * h_dim) * f32
    need = 2 * weights + 2 * (acts_in + acts_out) + scratch
    return int(min(max(4 * need, 8 * 1024 * 1024), 48 * 1024 * 1024))


def attention_forward(v, q, params, *, target_rows=512):
    """v: [B, K, vdim], q: [B, qdim] -> softmax attention weights [B, K, 1] (f32)."""
    batch, k, vdim = v.shape
    qdim = q.shape[1]

    # Fold weight_norm(dim=None): W_eff = g * V / ||V||_F (scalar g, Frobenius norm).
    w1 = params["g1"] * params["w1_v"] / jnp.linalg.norm(params["w1_v"])   # [H, vdim+qdim]
    w2 = params["g2"] * params["w2_v"] / jnp.linalg.norm(params["w2_v"])   # [1, H]
    h_dim = w1.shape[0]

    # Split W1 along its input axis so q is projected once per batch element; the
    # concatenated [B, K, vdim+qdim] tensor is never materialized in HBM.
    w1v_t = w1[:, :vdim].T.astype(jnp.bfloat16)          # [vdim, H]
    w1q_t = w1[:, vdim:].T.astype(jnp.bfloat16)          # [qdim, H]
    b1 = params["b1"].reshape(1, h_dim).astype(jnp.float32)
    w2_row = w2.reshape(1, h_dim).astype(jnp.float32)
    # b2 is deliberately omitted: softmax(logits + b2) == softmax(logits) for scalar b2.

    v_rows = v.reshape(batch * k, vdim).astype(jnp.bfloat16)   # row-fused activations
    q_bf = q.astype(jnp.bfloat16)

    tb = _choose_batch_tile(batch, k, target_rows)
    tm = tb * k
    grid = (batch // tb,)

    out = pl.pallas_call(
        _attention_kernel,
        out_shape=jax.ShapeDtypeStruct((batch, k), jnp.float32),
        grid_spec=pltpu.PrefetchScalarGridSpec(
            num_scalar_prefetch=0,
            grid=grid,
            in_specs=[
                pl.BlockSpec((tm, vdim), lambda i: (i, 0)),      # v rows for TB batch elems
                pl.BlockSpec((tb, qdim), lambda i: (i, 0)),      # q rows
                pl.BlockSpec((vdim, h_dim), lambda i: (0, 0)),   # resident weights
                pl.BlockSpec((qdim, h_dim), lambda i: (0, 0)),
                pl.BlockSpec((1, h_dim), lambda i: (0, 0)),
                pl.BlockSpec((1, h_dim), lambda i: (0, 0)),
            ],
            out_specs=pl.BlockSpec((tb, k), lambda i: (i, 0)),   # lane-dense [TB, K] block
        ),
        compiler_params=pltpu.CompilerParams(
            dimension_semantics=("parallel",),
            vmem_limit_bytes=_vmem_limit_bytes(tm, tb, vdim, qdim, k, h_dim),
        ),
    )(v_rows, q_bf, w1v_t, w1q_t, b1, w2_row)

    # Free layout plumbing: [B, K] -> [B, K, 1] to match nn.functional.softmax(logits, 1).
    return out[..., None]


def init_params(key, v_dim, q_dim, num_hid):
    """Deterministic synthetic parameters matching Attention.__init__ shapes."""
    k1, k2, k3, k4 = jax.random.split(key, 4)
    d = v_dim + q_dim
    w1_v = jax.random.normal(k1, (num_hid, d), jnp.float32) * 0.1    # FCNet Linear weight_v
    b1 = jax.random.normal(k2, (num_hid,), jnp.float32) * 0.1
    w2_v = jax.random.normal(k3, (1, num_hid), jnp.float32) * 0.1    # final Linear weight_v
    b2 = jax.random.normal(k4, (1,), jnp.float32) * 0.1
    # weight_norm init: g = ||V||_F, so the effective weight initially equals V.
    g1 = jnp.linalg.norm(w1_v)
    g2 = jnp.linalg.norm(w2_v)
    return {"w1_v": w1_v, "g1": g1, "b1": b1, "w2_v": w2_v, "g2": g2, "b2": b2}


def attention_reference(v, q, params):
    """Pure-JAX f32 reference that follows the PyTorch module literally."""
    w1 = params["g1"] * params["w1_v"] / jnp.linalg.norm(params["w1_v"])
    w2 = params["g2"] * params["w2_v"] / jnp.linalg.norm(params["w2_v"])
    B, K, _ = v.shape
    q_exp = jnp.broadcast_to(q[:, None, :], (B, K, q.shape[1]))
    vq = jnp.concatenate([v, q_exp], axis=2)
    h = jax.nn.relu(vq @ w1.T + params["b1"])
    logits = h @ w2.T + params["b2"]          # [B, K, 1]
    return jax.nn.softmax(logits, axis=1)


if __name__ == "__main__":
    # Small shapes consistent with the forward pass: batch=2, k=8 objects,
    # v_dim=16, q_dim=16, num_hid=32.
    B, K, V_DIM, Q_DIM, NUM_HID = 2, 8, 16, 16, 32

    key = jax.random.PRNGKey(0)
    kp, kv, kq = jax.random.split(key, 3)
    params = init_params(kp, V_DIM, Q_DIM, NUM_HID)
    v = jax.random.normal(kv, (B, K, V_DIM), jnp.float32)
    q = jax.random.normal(kq, (B, Q_DIM), jnp.float32)

    out = attention_forward(v, q, params)
    out = jax.block_until_ready(out)

    ref = attention_reference(v, q, params)
    assert out.shape == (B, K, 1)
    # Kernel streams bf16 inputs (f32 accumulation) and uses the approx reciprocal,
    # so compare against the all-f32 reference with a correspondingly loose tolerance.
    assert jnp.allclose(out, ref, atol=1e-2, rtol=1e-2), "mismatch vs reference"
    assert jnp.allclose(jnp.sum(out, axis=1), 1.0, atol=5e-3), "softmax not normalized"

    print("KERNEL_OK")
</pallas_src>

<mosaic_0001>
module attributes {stable_mosaic.version = 11 : i64} {
  func.func @_attention_kernel(%arg0: i32, %arg1: memref<16x16xbf16, #tpu.memory_space<vmem>>, %arg2: memref<2x16xbf16, #tpu.memory_space<vmem>>, %arg3: memref<16x32xbf16, #tpu.memory_space<vmem>>, %arg4: memref<16x32xbf16, #tpu.memory_space<vmem>>, %arg5: memref<1x32xf32, #tpu.memory_space<vmem>>, %arg6: memref<1x32xf32, #tpu.memory_space<vmem>>, %arg7: memref<2x8xf32, #tpu.memory_space<vmem>>) attributes {dimension_semantics = [#tpu.dimension_semantics<parallel>], iteration_bounds = array<i64: 1>, scalar_prefetch = 0 : i64, scratch_operands = 0 : i64, tpu.core_type = #tpu.core_type<tc>, window_params = [{transform_indices = @transform_0, window_bounds = array<i64: 16, 16>}, {transform_indices = @transform_1, window_bounds = array<i64: 2, 16>}, {pipeline_mode = #tpu.pipeline_mode<synchronous>, transform_indices = @transform_2, window_bounds = array<i64: 16, 32>}, {pipeline_mode = #tpu.pipeline_mode<synchronous>, transform_indices = @transform_3, window_bounds = array<i64: 16, 32>}, {pipeline_mode = #tpu.pipeline_mode<synchronous>, transform_indices = @transform_4, window_bounds = array<i64: 1, 32>}, {pipeline_mode = #tpu.pipeline_mode<synchronous>, transform_indices = @transform_5, window_bounds = array<i64: 1, 32>}, {transform_indices = @transform_6, window_bounds = array<i64: 2, 8>}]} {
    %c0 = arith.constant 0 : index
    %c0_0 = arith.constant 0 : index
    %0 = vector.load %arg1[%c0, %c0_0] : memref<16x16xbf16, #tpu.memory_space<vmem>>, vector<16x16xbf16>
    %c0_1 = arith.constant 0 : index
    %c0_2 = arith.constant 0 : index
    %1 = vector.load %arg3[%c0_1, %c0_2] : memref<16x32xbf16, #tpu.memory_space<vmem>>, vector<16x32xbf16>
    %cst = arith.constant dense<0.000000e+00> : vector<16x32xf32>
    %2 = tpu.matmul %0, %1, %cst {dimension_numbers = #tpu.dot_dimension_numbers<[1], [0], [0], [1], [0, 0, 1, 1], [], []>} : vector<16x16xbf16>, vector<16x32xbf16>, vector<16x32xf32> -> vector<16x32xf32>
    %c0_3 = arith.constant 0 : index
    %c0_4 = arith.constant 0 : index
    %3 = vector.load %arg2[%c0_3, %c0_4] : memref<2x16xbf16, #tpu.memory_space<vmem>>, vector<2x16xbf16>
    %c0_5 = arith.constant 0 : index
    %c0_6 = arith.constant 0 : index
    %4 = vector.load %arg4[%c0_5, %c0_6] : memref<16x32xbf16, #tpu.memory_space<vmem>>, vector<16x32xbf16>
    %cst_7 = arith.constant dense<0.000000e+00> : vector<2x32xf32>
    %5 = tpu.matmul %3, %4, %cst_7 {dimension_numbers = #tpu.dot_dimension_numbers<[1], [0], [0], [1], [0, 0, 1, 1], [], []>} : vector<2x16xbf16>, vector<16x32xbf16>, vector<2x32xf32> -> vector<2x32xf32>
    %6 = vector.shape_cast %2 : vector<16x32xf32> to vector<2x8x32xf32>
    %7 = vector.shape_cast %5 : vector<2x32xf32> to vector<2x1x32xf32>
    %8 = vector.broadcast %7 : vector<2x1x32xf32> to vector<2x8x32xf32>
    %9 = arith.addf %6, %8 : vector<2x8x32xf32>
    %c0_8 = arith.constant 0 : index
    %c0_9 = arith.constant 0 : index
    %10 = vector.load %arg5[%c0_8, %c0_9] : memref<1x32xf32, #tpu.memory_space<vmem>>, vector<1x32xf32>
    %11 = vector.shape_cast %10 : vector<1x32xf32> to vector<1x1x32xf32>
    %12 = vector.broadcast %11 : vector<1x1x32xf32> to vector<2x8x32xf32>
    %13 = arith.addf %9, %12 : vector<2x8x32xf32>
    %cst_10 = arith.constant 0.000000e+00 : f32
    %14 = vector.broadcast %cst_10 : f32 to vector<2x8x32xf32>
    %15 = arith.maximumf %13, %14 : vector<2x8x32xf32>
    %c0_11 = arith.constant 0 : index
    %c0_12 = arith.constant 0 : index
    %16 = vector.load %arg6[%c0_11, %c0_12] : memref<1x32xf32, #tpu.memory_space<vmem>>, vector<1x32xf32>
    %17 = vector.shape_cast %16 : vector<1x32xf32> to vector<1x1x32xf32>
    %18 = vector.broadcast %17 : vector<1x1x32xf32> to vector<2x8x32xf32>
    %19 = arith.mulf %15, %18 : vector<2x8x32xf32>
    %cst_13 = arith.constant dense<0.000000e+00> : vector<2x8xf32>
    %20 = vector.multi_reduction <add>, %19, %cst_13 [2] : vector<2x8x32xf32> to vector<2x8xf32>
    %cst_14 = arith.constant dense<0xFF800000> : vector<2xf32>
    %21 = vector.multi_reduction <maximumf>, %20, %cst_14 [1] : vector<2x8xf32> to vector<2xf32>
    %22 = vector.shape_cast %21 : vector<2xf32> to vector<2x1xf32>
    %23 = vector.broadcast %22 : vector<2x1xf32> to vector<2x8xf32>
    %24 = arith.subf %20, %23 : vector<2x8xf32>
    %25 = math.exp %24 : vector<2x8xf32>
    %cst_15 = arith.constant dense<0.000000e+00> : vector<2xf32>
    %26 = vector.multi_reduction <add>, %25, %cst_15 [1] : vector<2x8xf32> to vector<2xf32>
    %27 = vector.shape_cast %26 : vector<2xf32> to vector<2x1xf32>
    %28 = tpu.reciprocal %27 {approx = true} : vector<2x1xf32> -> vector<2x1xf32>
    %29 = vector.broadcast %28 : vector<2x1xf32> to vector<2x8xf32>
    %30 = arith.mulf %25, %29 : vector<2x8xf32>
    %c0_16 = arith.constant 0 : index
    %c0_17 = arith.constant 0 : index
    %31 = vector.load %arg7[%c0_16, %c0_17] : memref<2x8xf32, #tpu.memory_space<vmem>>, vector<2x8xf32>
    tpu.vector_store %arg7[%c0_16, %c0_17], %30 {strides = array<i32>} : memref<2x8xf32, #tpu.memory_space<vmem>>, vector<2x8xf32>,
    return
  }
  func.func @transform_0(%arg0: i32) -> (i32, i32) {
    %c0_i32 = arith.constant 0 : i32
    %c0_i32_0 = arith.constant 0 : i32
    return %arg0, %c0_i32 : i32, i32
  }
  func.func @transform_1(%arg0: i32) -> (i32, i32) {
    %c0_i32 = arith.constant 0 : i32
    %c0_i32_0 = arith.constant 0 : i32
    return %arg0, %c0_i32 : i32, i32
  }
  func.func @transform_2(%arg0: i32) -> (i32, i32) {
    %c0_i32 = arith.constant 0 : i32
    %c0_i32_0 = arith.constant 0 : i32
    %c0_i32_1 = arith.constant 0 : i32
    return %c0_i32, %c0_i32_0 : i32, i32
  }
  func.func @transform_3(%arg0: i32) -> (i32, i32) {
    %c0_i32 = arith.constant 0 : i32
    %c0_i32_0 = arith.constant 0 : i32
    %c0_i32_1 = arith.constant 0 : i32
    return %c0_i32, %c0_i32_0 : i32, i32
  }
  func.func @transform_4(%arg0: i32) -> (i32, i32) {
    %c0_i32 = arith.constant 0 : i32
    %c0_i32_0 = arith.constant 0 : i32
    %c0_i32_1 = arith.constant 0 : i32
    return %c0_i32, %c0_i32_0 : i32, i32
  }
  func.func @transform_5(%arg0: i32) -> (i32, i32) {
    %c0_i32 = arith.constant 0 : i32
    %c0_i32_0 = arith.constant 0 : i32
    %c0_i32_1 = arith.constant 0 : i32
    return %c0_i32, %c0_i32_0 : i32, i32
  }
  func.func @transform_6(%arg0: i32) -> (i32, i32) {
    %c0_i32 = arith.constant 0 : i32
    %c0_i32_0 = arith.constant 0 : i32
    return %arg0, %c0_i32 : i32, i32
  }
}

</mosaic_0001>

<bundles_post_ra>
// kernel: tpu_custom_call.1
= control target key start
LH: loop header
LB: loop body
LE: loop exit
PB: predicated region body
PF: predicated region fallthrough
CT: control target
= control target key end

     0   :  { %11 = vsyncpa [#allocation3], 0  ;;  %s486_s0 = inlined_call_operand.hbm [shape: bf16[16,16], index: 0, kind: input, shape index: {}]   ;;  %s487_s1 = inlined_call_operand.hbm [shape: bf16[2,16], index: 1, kind: input, shape index: {}]   ;;  %s488_s2 = inlined_call_operand.hbm [shape: bf16[16,32], index: 2, kind: input, shape index: {}]   ;;  %s489_s3 = inlined_call_operand.hbm [shape: bf16[16,32], index: 3, kind: input, shape index: {}]   ;;  %s490_s4 = inlined_call_operand.vmem [shape: f32[1,32], index: 4, kind: input, shape index: {}]   ;;  %s491_s5 = inlined_call_operand.vmem [shape: f32[1,32], index: 5, kind: input, shape index: {}]   ;;  %s492_s6 = inlined_call_operand.hbm [shape: f32[2,8], index: 6, kind: output, shape index: {}]  }
   0x1   :  { %12 = vsyncpa [#allocation6], 0 }
   0x2   :  { %13 = vsyncpa [#allocation9], 0  ;;  %s33_s23 = sshll.u32 %s487_s1, 4  ;;  %s34_s23 = int_to_ptr.hbm [resolvable:$true] %s33_s23 }
   0x3   :  { %14 = vsyncpa [#allocation4], 0  ;;  %s416_s24 = smov [#allocation5]   ;;  %s19_s28 = sshll.u32 %s486_s0, 4  ;;  %s20_s28 = int_to_ptr.hbm [resolvable:$true] %s19_s28 }
   0x4   :  { %s35_s25 = sshll.u32 %s416_s24, 4  ;;  %s417_s29 = smov [#allocation2]   ;;  %s36_s25 = int_to_ptr.vmem [resolvable:$true] %s35_s25 }
   0x5   :  { %38 = dma.hbm_to_vmem [thread:$0]  %s34_s23, 16, %s36_s25, [#allocation6]  }
   0x6   :  { %s21_s30 = sshll.u32 %s417_s29, 4  ;;  %s418_s7 = smov 64   ;;  %s22_s30 = int_to_ptr.vmem [resolvable:$true] %s21_s30 }
   0x7   :  { %s419_s8 = smov 4   ;;  %s43_s1 = sshll.u32 %s488_s2, 4  ;;  %s44_s1 = int_to_ptr.hbm [resolvable:$true] %s43_s1 }
   0x8   :  { %27 = dma.hbm_to_vmem [thread:$0]  %s20_s28, 128, %s22_s30, [#allocation3], %s418_s7, %s418_s7, %s419_s8  }
   0x9   :  { %s420_s11 = smov [#allocation7]   ;;  %s56_s0 = sshll.u32 %s489_s3, 4  ;;  %s57_s0 = int_to_ptr.hbm [resolvable:$true] %s56_s0 }
   0xa   :  { %s45_s12 = sshll.u32 %s420_s11, 4  ;;  %s421_s15 = smov [#allocation8]   ;;  %s46_s12 = int_to_ptr.vmem [resolvable:$true] %s45_s12 }
   0xb   :  { %51 = dma.hbm_to_vmem [thread:$0]  %s44_s1, 128, %s46_s12, [#allocation6], %s418_s7, %s418_s7, %s419_s8  }
   0xc   :  { %s58_s16 = sshll.u32 %s421_s15, 4  ;;  %s59_s16 = int_to_ptr.vmem [resolvable:$true] %s58_s16 }
   0xd   :  { %64 = dma.hbm_to_vmem [thread:$0]  %s57_s0, 128, %s59_s16, [#allocation9], %s418_s7, %s418_s7, %s419_s8  }
   0xe   :  { %408 = dma.done.wait [#allocation3], 128  }
   0xf   :  { %409 = vsyncadd [#allocation3], 4294967168 }
  0x10   :  { %410 = dma.done.wait [#allocation6], 144  }
  0x11   :  { %411 = vsyncadd [#allocation6], 4294967152 }
  0x12   :  { %412 = dma.done.wait [#allocation9], 128  }
  0x13   :  { %413 = vsyncadd [#allocation9], 4294967168  ;;  %v267_v0 = vld [vmem:[#allocation7] sm:$0xff]  ;;  %v268_v1 = vld [vmem:[#allocation8] sm:$0xff]  ;;  %vm101_vm0 = vcmask 130048   ;;  %vm166_vm1 = vcmask 261120   ;;  %v175_v24 = vlaneseq }
  0x14   :  { %v266_v2 = vld [vmem:[#allocation2] sm:$0xff]  ;;  %112 = vmatpush.bf16.msra.mxu0 %v267_v0  ;;  %138 = vmatpush.bf16.msra.mxu1 %v268_v1  ;;  %v119_v3 = vld [vmem:[#allocation5] sm:$0x1]  ;;  %vm179_vm2 = vcmask 1041409   ;;  %vm182_vm3 = vcmask 58368   ;;  %v422_v31 = vmov 0  }
  0x15   :  { %v280_v7 = vld [vmem:[%s490_s4] ss:$0 sm:$0xff]  ;;  %v176_v25 = vand.u32 127, %v175_v24  ;;  %278 = vset.pattern.permute.xlu2 %v422_v31  ;;  %277 = vset.pattern.permute.xlu1 %v422_v31  ;;  %s423_s4 = smov [#allocation10]   ;;  %s240_s21 = sshll.u32 %s492_s6, 4  ;;  %s241_s21 = int_to_ptr.hbm [resolvable:$true] %s240_s21 }
  0x16   :  { %v281_v11 = vld [vmem:[%s491_s5] ss:$0 sm:$0xff]  ;;  %279 = vset.pattern.permute.xlu0 %v422_v31  ;;  %s238_s5 = sshll.u32 %s423_s4, 4  ;;  %s239_s5 = int_to_ptr.vmem [resolvable:$true] %s238_s5 }
  0x17   :  { %260 = vmatmul.msk.bf16.vlgmr.msra.gmra.mxu0 %vm101_vm0, %v266_v2  ;;  %265 = vmatmul.msk.bf16.vlgmr.msra.gmra.mxu1 %vm101_vm0, %v119_v3 }
  0x94   :  { %v114_v4 = vpop.f32.mrf.mxu0  ;;  %v140_v5 = vpop.f32.mrf.mxu1 }
  0x95   :  { %v146_v6 = vperm.slane %v140_v5, 0  ;;  %v145_v8 = vrot.slane %v140_v5, 1 }
  0x97   :  { %v150_v9 = vadd.f32 %v146_v6, %v114_v4  ;;  %v147_v12 = vperm.slane %v145_v8, 0 }
  0x99   :  { %v156_v10 = vadd.f32 %v280_v7, %v150_v9 }
  0x9b   :  { %v158_v13 = vmax.f32 %v156_v10, 0.0 }
  0x9c   :  { %v116_v14 = vpop.f32.mrf.mxu0  ;;  %v142_v15 = vpop.f32.mrf.mxu1 }
  0x9d   :  { %v151_v16 = vadd.f32 %v147_v12, %v116_v14  ;;  %v164_v17 = vmul.f32 %v281_v11, %v158_v13 }
  0x9f   :  { %v157_v18 = vadd.f32 %v280_v7, %v151_v16  ;;  %v167_v19 = vsel %vm166_vm1, %v164_v17, 0.0 }
  0xa0   :  { %168 = vadd.xlane.f32.xlu0 %v167_v19 }
  0xa1   :  { %v159_v20 = vmax.f32 %v157_v18, 0.0 }
  0xa3   :  { %v165_v21 = vmul.f32 %v281_v11, %v159_v20 }
  0xa5   :  { %v170_v22 = vsel %vm166_vm1, %v165_v21, 0.0 }
  0xa8   :  { %171 = vadd.xlane.f32.xlu0 %v170_v22 }
 0x113   :  { %v169_v23 = vpop.xlane.xlu0 %168 }
 0x114   :  { %v177_v27 = vperm.slane %v169_v23, %v176_v25 }
 0x11b   :  { %v172_v26 = vpop.xlane.xlu0 %171 }
 0x11c   :  { %v178_v28 = vperm.slane %v172_v26, %v176_v25 }
 0x11e   :  { %v180_v29 = vsel %vm179_vm2, %v178_v28, %v177_v27 }
 0x11f   :  { %v183_v30 = vsel %vm182_vm3, %v180_v29, -inf }
 0x120   :  { %184 = vmax.xlane.f32.xlu1 %v183_v30 }
 0x193   :  { %v185_v32 = vpop.xlane.xlu1 %184 }
 0x194   :  { %v187_v33 = vperm.slane %v185_v32, 0  ;;  %v188_v34 = vperm.slane %v185_v32, 1 }
 0x196   :  { %v191_v35 = vsub.f32 %v169_v23, %v187_v33  ;;  %v192_v36 = vsub.f32 %v172_v26, %v188_v34 }
 0x198   :  { %v193_v37 = vmul.f32 1.442695, %v191_v35  ;;  %v195_v38 = vmul.f32 1.442695, %v192_v36 }
 0x19a   :  { %282 = vpow2.f32 %v193_v37 }
 0x19b   :  { %284 = vpow2.f32 %v195_v38 }
 0x1a0   :  { %v283_v39 = vpop.eup %282 }
 0x1a1   :  { %v285_v40 = vpop.eup %284  ;;  %200 = vperm.xlu1 %277, %v283_v39  }
 0x1a2   :  { %203 = vperm.xlu2 %278, %v285_v40  }
 0x1fc   :  { %v204_v41 = vpop.permute.xlu2 %203 }
 0x1fd   :  { %v206_v43 = vperm.slane %v204_v41, %v176_v25 }
 0x213   :  { %v201_v42 = vpop.permute.xlu1 %200 }
 0x214   :  { %v205_v44 = vperm.slane %v201_v42, %v176_v25 }
 0x216   :  { %v207_v45 = vsel %vm179_vm2, %v206_v43, %v205_v44 }
 0x217   :  { %v209_v46 = vsel %vm182_vm3, %v207_v45, 0.0 }
 0x218   :  { %210 = vadd.xlane.f32.xlu2 %v209_v46 }
 0x28b   :  { %v211_v47 = vpop.xlane.xlu2 %210 }
 0x28c   :  { %286 = vrcp.f32 %v211_v47 }
 0x292   :  { %v287_v48 = vpop.eup %286 }
 0x293   :  { %v215_v49 = vperm.slane %v287_v48, 1  ;;  %v214_v50 = vperm.slane %v287_v48, 0 }
 0x295   :  { %v219_v51 = vmul.f32 %v285_v40, %v215_v49  ;;  %v218_v52 = vmul.f32 %v283_v39, %v214_v50 }
 0x297   :  { %226 = vperm.xlu1 %277, %v219_v51   ;;  %223 = vperm.xlu0 %279, %v218_v52  }
 0x309   :  { %v227_v53 = vpop.permute.xlu1 %226  ;;  %v224_v54 = vpop.permute.xlu0 %223 }
 0x30a   :  { %v229_v55 = vperm.slane %v227_v53, %v176_v25  ;;  %v228_v56 = vperm.slane %v224_v54, %v176_v25 }
 0x30c   :  { %v230_v57 = vsel %vm179_vm2, %v229_v55, %v228_v56 }
 0x30d   :  { %232 = vst.msk [vmem:[#allocation10] sm:$0x3] %vm182_vm3, %v230_v57 }
 0x30e   :  { %243 = dma.vmem_to_hbm [thread:$0]  %s239_s5, 32, %s241_s21, [#allocation4]  }
 0x30f   :  { %414 = dma.done.wait [#allocation4], 32  }
 0x310   :  { %415 = vsyncadd [#allocation4], 4294967264 }
 0x311   :  { %248 = vsyncpa [#allocation3], 1 }
 0x312   :  { %249 = vsyncpa [#allocation6], 1 }
 0x313   :  { %250 = vsyncpa [#allocation9], 1 }
 0x314   :  { %251 = vsyncpa [#allocation4], 1 }

</bundles_post_ra>
